<compile_context>
chip_gen: v7x
topology: tpu7x:2x2x1
jax: 0.10.0
libtpu: 0.0.40
codegen_flags: <defaults>
</compile_context>

<pallas_src>
import functools
import math

import jax
import jax.numpy as jnp
from jax.experimental import pallas as pl
from jax.experimental.pallas import tpu as pltpu

_LANE = 128
_DEFAULT_MAX_BLOCK_ROWS = 256      # sized for the 256x256 MXU on v6e/v7x; fine on v5e


def _round_up(x, m):
    return ((x + m - 1) // m) * m


def _row_align(itemsize):
    # Sublane packing of the second-minor dim: f32 -> 8, bf16 -> 16, int8/fp8 -> 32.
    return {4: 8, 2: 16, 1: 32}.get(int(itemsize), 8)


def _vmem_budget_bytes():
    """Generation-aware scoped-VMEM budget and limit (bytes)."""
    try:
        cap = int(pltpu.get_tpu_info().vmem_capacity_bytes)
    except Exception:
        cap = 64 * 2**20                       # conservative (v7x-sized) fallback
    budget = max(24 * 2**20, cap - 32 * 2**20)  # ~96 MiB on 128 MiB parts, 32 MiB on v7x
    limit = max(budget, min(cap - 12 * 2**20, budget + 16 * 2**20))
    return budget, limit


def _block_vmem_bytes(tm, td, d, in_isz, out_isz, w_bufs):
    # x row block double-buffered; weight tile single- or double-buffered;
    # (tm, 2, td) output block double-buffered.  The size-2 sublane axis of the
    # output block is conservatively counted as a full 8-sublane tile.
    return (2 * tm * d * in_isz
            + w_bufs * d * td * in_isz
            + 2 * tm * 8 * td * out_isz)


def _pick_tiles(n, D, d, in_isz, out_isz, row_align, max_rows, max_cols, budget):
    """Returns (row_block, d_block, num_d_blocks)."""
    tm = _round_up(min(max_rows, max(n, row_align)), row_align)
    while True:
        # Resident-weight fast path: one D tile, weight single-buffered.
        if D <= max_cols and _block_vmem_bytes(tm, D, d, in_isz, out_isz, 1) <= budget:
            return tm, D, 1
        # Streaming path: largest lane-aligned D tile with a double-buffered weight.
        td = min(int(max_cols), D)
        td -= td % _LANE
        while td >= _LANE:
            if _block_vmem_bytes(tm, td, d, in_isz, out_isz, 2) <= budget:
                return tm, td, int(pl.cdiv(D, td))
            td -= _LANE
        if tm <= row_align:
            raise ValueError(
                f"RFF tiles do not fit the VMEM budget ({budget} bytes): "
                f"row_block={tm}, D={D}, d={d}")
        tm = max(row_align, _round_up(tm // 2, row_align))


def _rff_kernel(x_ref, w_ref, z_ref, *, inv_sigma, scale):
    # Scale the (tm, d) activations (cheaper than scaling the (tm, tD) logits).
    xs = x_ref[...] * inv_sigma
    # q = (x / sigma) @ w.T for this (row block, D tile).  The weight arrives
    # pre-transposed as (d, tD), so the MXU consumes it directly (no per-step
    # transpose of the weight tile); accumulation is in f32.
    q = jnp.dot(xs, w_ref[...], preferred_element_type=jnp.float32)
    # Fused torch.cat([cos, sin], -1) via the (N, 2, D) output layout: both halves
    # are lane-dense, zero-offset stores regardless of D % 128.
    z_ref[:, 0, :] = (scale * jnp.cos(q)).astype(z_ref.dtype)
    z_ref[:, 1, :] = (scale * jnp.sin(q)).astype(z_ref.dtype)


def rff_feature_map(x, w, sigma, *, compute_dtype=jnp.bfloat16, out_dtype=None,
                    max_block_rows=_DEFAULT_MAX_BLOCK_ROWS, max_block_cols=None):
    """Pallas TPU implementation of RFFFeatureMap.forward.

    x: (N, d) activations; w: (D, d) fixed random weights (module layout);
    returns z: (N, 2*D) with the same layout as torch.cat([cos, sin], -1).

    compute_dtype: dtype used for the MXU inputs (default bf16 — random Gaussian
    weights are numerically benign in bf16; accumulation stays f32).
    out_dtype: dtype of z (default: x.dtype; pass jnp.bfloat16 to halve the
    dominant HBM writeback in the large-N regime).
    """
    x = jnp.asarray(x)
    w = jnp.asarray(w)
    N, d = x.shape
    D, d2 = w.shape
    assert d == d2, "feature dims of x and w must match"

    cdt = jnp.dtype(compute_dtype) if compute_dtype is not None else jnp.dtype(x.dtype)
    odt = jnp.dtype(out_dtype) if out_dtype is not None else jnp.dtype(x.dtype)

    # w is a fixed parameter: cast + transpose once to (d, D) (fused with the bf16
    # convert; callers with a static weight should hoist/jit this so it happens once).
    w_t = w.astype(cdt).T
    x_c = x.astype(cdt)

    in_isz = cdt.itemsize
    out_isz = odt.itemsize
    row_align = _row_align(in_isz)
    budget, vmem_limit = _vmem_budget_bytes()
    max_cols = int(max_block_cols) if max_block_cols is not None else max(D, _LANE)

    tm, td, n_d_blocks = _pick_tiles(N, D, d, in_isz, out_isz, row_align,
                                     max_block_rows, max_cols, budget)

    # Pad rows up to a multiple of the chosen row block (never shrink the block).
    n_rows = _round_up(max(N, 1), tm)
    if n_rows != N:
        x_c = jnp.pad(x_c, ((0, n_rows - N), (0, 0)))
    n_row_blocks = n_rows // tm

    # Rows innermost -> each weight tile is DMA'd once per D tile and reused
    # across every row block (Pallas skips re-copies when the block index repeats).
    grid = (n_d_blocks, n_row_blocks)

    if n_d_blocks == 1:
        # Constant index map -> single-buffer the resident weight (halves its VMEM).
        w_spec = pl.BlockSpec((d, td), lambda j, i: (0, j), pipeline_mode=pl.Buffered(1))
    else:
        w_spec = pl.BlockSpec((d, td), lambda j, i: (0, j))

    in_specs = [
        pl.BlockSpec((tm, d), lambda j, i: (i, 0)),     # x row block
        w_spec,                                         # (d, tD) weight tile
    ]
    out_specs = pl.BlockSpec((tm, 2, td), lambda j, i: (i, 0, j))

    kernel = functools.partial(
        _rff_kernel,
        inv_sigma=1.0 / float(sigma),
        scale=float(math.sqrt(2.0 / D)),
    )

    cost = pl.CostEstimate(
        flops=2 * n_rows * D * d,
        transcendentals=2 * n_rows * D,
        bytes_accessed=(n_rows * d + D * d) * in_isz + n_rows * 2 * D * out_isz,
    )

    z3 = pl.pallas_call(
        kernel,
        out_shape=jax.ShapeDtypeStruct((n_rows, 2, D), odt),
        grid=grid,
        in_specs=in_specs,
        out_specs=out_specs,
        compiler_params=pltpu.CompilerParams(
            dimension_semantics=("parallel", "parallel"),
            vmem_limit_bytes=int(vmem_limit),
        ),
        cost_estimate=cost,
    )(x_c, w_t)

    # Free reshape: (N, 2, D) row-major == torch.cat([cos, sin], -1) row-major.
    z = z3.reshape(n_rows, 2 * D)
    return z[:N] if n_rows != N else z


def rff_reference(x, w, sigma):
    q = x @ w.T
    return math.sqrt(2.0 / w.shape[0]) * jnp.concatenate(
        [jnp.cos(q / sigma), jnp.sin(q / sigma)], axis=-1)


if __name__ == "__main__":
    key = jax.random.PRNGKey(0)
    kx1, kw1, kx2, kw2 = jax.random.split(key, 4)

    sigma = 1.5
    d_in, D_feat = 128, 256           # small stand-ins for the module's d=1024, D=10000
    num_frames, num_atoms = 2, 8
    N1 = num_frames * num_atoms       # 16

    x1 = jax.random.normal(kx1, (N1, d_in), dtype=jnp.float32)
    w = jax.random.normal(kw1, (D_feat, d_in), dtype=jnp.float32)   # ~ torch.randn(D, d)
    z1_ref = rff_reference(x1, w, sigma)

    # 1) f32 compute path (resident, single-buffered weight; single grid step).
    z1 = jax.block_until_ready(rff_feature_map(x1, w, sigma, compute_dtype=jnp.float32))
    assert z1.shape == (N1, 2 * D_feat)
    assert jnp.allclose(z1, z1_ref, atol=1e-4, rtol=1e-4)

    # Call-site post-processing from the notebook (pure JAX glue, not part of forward()).
    z_pooled = z1.reshape(num_frames, num_atoms, -1).mean(axis=1)
    jax.block_until_ready(z_pooled)

    # 2) Default bf16-compute MXU path (f32 accumulation) — looser tolerance.
    z1b = jax.block_until_ready(rff_feature_map(x1, w, sigma))
    assert jnp.allclose(z1b, z1_ref, atol=3e-2)

    # 3) Larger, non-aligned N -> padded rows, multi-row-block pipelined grid.
    N2 = 500
    x2 = jax.random.normal(kx2, (N2, d_in), dtype=jnp.float32)
    z2 = jax.block_until_ready(rff_feature_map(x2, w, sigma))
    assert z2.shape == (N2, 2 * D_feat)
    assert jnp.allclose(z2, rff_reference(x2, w, sigma), atol=3e-2)

    # 4) Force the D-tiled streaming-weight path (incl. a partial edge D tile),
    #    as used for the real D=10000 workload.
    D3 = 384
    w3 = jax.random.normal(kw2, (D3, d_in), dtype=jnp.float32)
    z3 = jax.block_until_ready(
        rff_feature_map(x1, w3, sigma, compute_dtype=jnp.float32, max_block_cols=256))
    assert jnp.allclose(z3, rff_reference(x1, w3, sigma), atol=1e-4, rtol=1e-4)

    print("KERNEL_OK")
</pallas_src>

<mosaic_0001>
module attributes {stable_mosaic.version = 11 : i64} {
  func.func @_rff_kernel(%arg0: i32, %arg1: i32, %arg2: memref<16x128xf32, #tpu.memory_space<vmem>>, %arg3: memref<128x256xf32, #tpu.memory_space<vmem>>, %arg4: memref<16x2x256xf32, #tpu.memory_space<vmem>>) attributes {dimension_semantics = [#tpu.dimension_semantics<parallel>, #tpu.dimension_semantics<parallel>], iteration_bounds = array<i64: 1, 1>, scalar_prefetch = 0 : i64, scratch_operands = 0 : i64, tpu.core_type = #tpu.core_type<tc>, window_params = [{transform_indices = @transform_0, window_bounds = array<i64: 16, 128>}, {pipeline_mode = #tpu.pipeline_mode<synchronous>, transform_indices = @transform_1, window_bounds = array<i64: 128, 256>}, {transform_indices = @transform_2, window_bounds = array<i64: 16, 2, 256>}]} {
    %c0 = arith.constant 0 : index
    %c0_0 = arith.constant 0 : index
    %0 = vector.load %arg2[%c0, %c0_0] : memref<16x128xf32, #tpu.memory_space<vmem>>, vector<16x128xf32>
    %cst = arith.constant 0.666666686 : f32
    %1 = vector.broadcast %cst : f32 to vector<16x128xf32>
    %2 = arith.mulf %0, %1 : vector<16x128xf32>
    %c0_1 = arith.constant 0 : index
    %c0_2 = arith.constant 0 : index
    %3 = vector.load %arg3[%c0_1, %c0_2] : memref<128x256xf32, #tpu.memory_space<vmem>>, vector<128x256xf32>
    %cst_3 = arith.constant dense<0.000000e+00> : vector<16x256xf32>
    %4 = tpu.matmul %2, %3, %cst_3 {dimension_numbers = #tpu.dot_dimension_numbers<[1], [0], [0], [1], [0, 0, 1, 1], [], []>} : vector<16x128xf32>, vector<128x256xf32>, vector<16x256xf32> -> vector<16x256xf32>
    %5 = math.cos %4 : vector<16x256xf32>
    %cst_4 = arith.constant 0.0883883461 : f32
    %6 = vector.broadcast %cst_4 : f32 to vector<16x256xf32>
    %7 = arith.mulf %6, %5 : vector<16x256xf32>
    %c0_5 = arith.constant 0 : index
    %c0_6 = arith.constant 0 : index
    %c0_7 = arith.constant 0 : index
    %8 = vector.load %arg4[%c0_5, %c0_6, %c0_7] : memref<16x2x256xf32, #tpu.memory_space<vmem>>, vector<16x1x256xf32>
    %9 = vector.shape_cast %8 : vector<16x1x256xf32> to vector<16x256xf32>
    %10 = vector.shape_cast %7 : vector<16x256xf32> to vector<16x1x256xf32>
    tpu.vector_store %arg4[%c0_5, %c0_6, %c0_7], %10 {strides = array<i32>} : memref<16x2x256xf32, #tpu.memory_space<vmem>>, vector<16x1x256xf32>,
    %11 = math.sin %4 : vector<16x256xf32>
    %cst_8 = arith.constant 0.0883883461 : f32
    %12 = vector.broadcast %cst_8 : f32 to vector<16x256xf32>
    %13 = arith.mulf %12, %11 : vector<16x256xf32>
    %c0_9 = arith.constant 0 : index
    %c1 = arith.constant 1 : index
    %c0_10 = arith.constant 0 : index
    %14 = vector.load %arg4[%c0_9, %c1, %c0_10] : memref<16x2x256xf32, #tpu.memory_space<vmem>>, vector<16x1x256xf32>
    %15 = vector.shape_cast %14 : vector<16x1x256xf32> to vector<16x256xf32>
    %16 = vector.shape_cast %13 : vector<16x256xf32> to vector<16x1x256xf32>
    tpu.vector_store %arg4[%c0_9, %c1, %c0_10], %16 {strides = array<i32>} : memref<16x2x256xf32, #tpu.memory_space<vmem>>, vector<16x1x256xf32>,
    return
  }
  func.func @transform_0(%arg0: i32, %arg1: i32) -> (i32, i32) {
    %c0_i32 = arith.constant 0 : i32
    %c0_i32_0 = arith.constant 0 : i32
    return %arg1, %c0_i32 : i32, i32
  }
  func.func @transform_1(%arg0: i32, %arg1: i32) -> (i32, i32) {
    %c0_i32 = arith.constant 0 : i32
    %c0_i32_0 = arith.constant 0 : i32
    return %c0_i32, %arg0 : i32, i32
  }
  func.func @transform_2(%arg0: i32, %arg1: i32) -> (i32, i32, i32) {
    %c0_i32 = arith.constant 0 : i32
    %c0_i32_0 = arith.constant 0 : i32
    return %arg1, %c0_i32, %arg0 : i32, i32, i32
  }
}

</mosaic_0001>

<bundles_post_ra>
// kernel: tpu_custom_call.1
= control target key start
LH: loop header
LB: loop body
LE: loop exit
PB: predicated region body
PF: predicated region fallthrough
CT: control target
= control target key end

     0   :  { %7 = vsyncpa [#allocation3], 0  ;;  %s1969_s0 = inlined_call_operand.hbm [shape: f32[16,128], index: 0, kind: input, shape index: {}]   ;;  %s1970_s1 = inlined_call_operand.hbm [shape: f32[128,256], index: 1, kind: input, shape index: {}]   ;;  %s1971_s2 = inlined_call_operand.hbm [shape: f32[16,2,256], index: 2, kind: output, shape index: {}]  }
   0x1   :  { %8 = vsyncpa [#allocation6], 0 }
   0x2   :  { %9 = vsyncpa [#allocation4], 0  ;;  %s1515_s9 = smov [#allocation2]   ;;  %s1443_s13 = scalar_lea.hbm %s1969_s0, 256 }
   0x3   :  { %s15_s10 = sshll.u32 %s1515_s9, 4  ;;  %p1444_p0 = scmp.ne.s32.totalorder %s1969_s0, %s1443_s13  ;;  %s16_s10 = int_to_ptr.vmem [resolvable:$true] %s15_s10 }
   0x4   :  { %p1447_p1 = scmp.lt.u32.totalorder %s1443_s13, %s1969_s0 }
   0x6   :  { %p1449_p2 = pnand %p1447_p1, %p1444_p0 }
   0x8   :  { %1452 = shalt.err (!%p1449_p2)
}
   0x9   :  { %s1453_s18 = scalar_lea.vmem %s16_s10, 256  ;;  %p1458_p4 = scmp.lt.s32.totalorder %s16_s10, %s16_s10 }
   0xa   :  { %p1454_p3 = scmp.ne.s32.totalorder %s16_s10, %s1453_s18  ;;  %p1459_p5 = scmp.lt.s32.totalorder %s1453_s18, %s1453_s18 }
   0xc   :  { %p1460_p6 = por %p1459_p5, %p1458_p4 }
   0xe   :  { %p1461_p7 = pnand %p1460_p6, %p1454_p3 }
  0x10   :  { %1464 = shalt.err (!%p1461_p7)
}
  0x11   :  { %s1516_s19 = smov 128   ;;  %s1517_s20 = smov 8  }
  0x12   :  { %21 = dma.hbm_to_vmem [thread:$0]  %s1969_s0, 256, %s16_s10, [#allocation3], %s1516_s19, %s1516_s19, %s1517_s20  }
  0x13   :  { %s1518_s23 = smov [#allocation5]   ;;  %s1465_s27 = scalar_lea.hbm %s1970_s1, 4096 }
  0x14   :  { %s27_s24 = sshll.u32 %s1518_s23, 4  ;;  %p1466_p8 = scmp.ne.s32.totalorder %s1970_s1, %s1465_s27  ;;  %s28_s24 = int_to_ptr.vmem [resolvable:$true] %s27_s24 }
  0x15   :  { %p1469_p9 = scmp.lt.u32.totalorder %s1465_s27, %s1970_s1 }
  0x17   :  { %p1471_p10 = pnand %p1469_p9, %p1466_p8 }
  0x19   :  { %1474 = shalt.err (!%p1471_p10)
}
  0x1a   :  { %s1475_s4 = scalar_lea.vmem %s28_s24, 4096  ;;  %p1480_p12 = scmp.lt.s32.totalorder %s28_s24, %s28_s24 }
  0x1b   :  { %p1476_p11 = scmp.ne.s32.totalorder %s28_s24, %s1475_s4  ;;  %p1481_p13 = scmp.lt.s32.totalorder %s1475_s4, %s1475_s4 }
  0x1d   :  { %p1482_p0 = por %p1481_p13, %p1480_p12 }
  0x1f   :  { %p1483_p1 = pnand %p1482_p0, %p1476_p11 }
  0x21   :  { %1486 = shalt.err (!%p1483_p1)
}
  0x22   :  { %s1519_s0 = smov 256   ;;  %s1520_s5 = smov 16  }
  0x23   :  { %33 = dma.hbm_to_vmem [thread:$0]  %s1970_s1, 4096, %s28_s24, [#allocation6], %s1519_s0, %s1519_s0, %s1520_s5  }
  0x24   :  { %1509 = dma.done.wait [#allocation3], 256  }
  0x25   :  { %1510 = vsyncadd [#allocation3], 4294967040 }
  0x26   :  { %1511 = dma.done.wait [#allocation6], 4096  }
  0x27   :  { %1512 = vsyncadd [#allocation6], 4294963200  ;;  %v1521_v0 = vmov 0.0   ;;  %v45_v1 = vld [vmem:[#allocation5 + $0x8] sm:$0xff]  ;;  %v47_v2 = vld [vmem:[#allocation5 + $0x18] sm:$0xff]  ;;  %s1529_s1 = smov [#allocation7]  }
  0x28   :  { %140 = vmatprep.mubr.f32.mxu0 %v1521_v0  ;;  %146 = vmatprep.mubr.f32.mxu1 %v1521_v0  ;;  %v44_v3 = vld [vmem:[#allocation5] sm:$0xff]  ;;  %v1346_v4 = vpack.c.bf16 %v47_v2, %v45_v1  ;;  %v46_v5 = vld [vmem:[#allocation5 + $0x10] sm:$0xff]  ;;  %v49_v6 = vld [vmem:[#allocation5 + $0x28] sm:$0xff]  ;;  %s1301_s8 = sshll.u32 %s1529_s1, 4  ;;  %s1302_s8 = int_to_ptr.vmem [resolvable:$true] %s1301_s8 }
  0x29   :  { %v51_v7 = vld [vmem:[#allocation5 + $0x38] sm:$0xff]  ;;  %v1348_v8 = vpack.c.bf16 %v46_v5, %v44_v3  ;;  %v48_v10 = vld [vmem:[#allocation5 + $0x20] sm:$0xff]  ;;  %v50_v11 = vld [vmem:[#allocation5 + $0x30] sm:$0xff]  ;;  %s1487_s9 = scalar_lea.vmem %s1302_s8, 1024  ;;  %p1492_p3 = scmp.lt.s32.totalorder %s1302_s8, %s1302_s8 }
  0x2a   :  { %v1350_v9 = vpack.c.bf16 %v51_v7, %v49_v6  ;;  %v53_v12 = vld [vmem:[#allocation5 + $0x48] sm:$0xff]  ;;  %1347 = vmatprep.subr.bf16.mxu0 %v1346_v4  ;;  %1378 = vmatprep.subr.bf16.mxu1 %v1346_v4  ;;  %v55_v13 = vld [vmem:[#allocation5 + $0x58] sm:$0xff]  ;;  %v1352_v14 = vpack.c.bf16 %v50_v11, %v48_v10  ;;  %v52_v16 = vld [vmem:[#allocation5 + $0x40] sm:$0xff]  ;;  %p1488_p2 = scmp.ne.s32.totalorder %s1302_s8, %s1487_s9  ;;  %p1493_p4 = scmp.lt.s32.totalorder %s1487_s9, %s1487_s9 }
  0x2b   :  { %1349 = vmatpush1.bf16.msra.mxu0 %v1348_v8  ;;  %1386 = vmatpush1.bf16.msra.mxu1 %v1348_v8  ;;  %v1354_v15 = vpack.c.bf16 %v55_v13, %v53_v12  ;;  %v54_v17 = vld [vmem:[#allocation5 + $0x50] sm:$0xff]  ;;  %v57_v18 = vld [vmem:[#allocation5 + $0x68] sm:$0xff]  ;;  %v59_v19 = vld [vmem:[#allocation5 + $0x78] sm:$0xff] }
  0x2c   :  { %1351 = vmatprep.subr.bf16.mxu0 %v1350_v9  ;;  %1379 = vmatprep.subr.bf16.mxu1 %v1350_v9  ;;  %v1356_v20 = vpack.c.bf16 %v54_v17, %v52_v16  ;;  %v1358_v21 = vpack.c.bf16 %v59_v19, %v57_v18  ;;  %v56_v22 = vld [vmem:[#allocation5 + $0x60] sm:$0xff]  ;;  %v58_v23 = vld [vmem:[#allocation5 + $0x70] sm:$0xff]  ;;  %v61_v24 = vld [vmem:[#allocation5 + $0x88] sm:$0xff]  ;;  %v1522_v18 = vmov 683565275   ;;  %p1494_p5 = por %p1493_p4, %p1492_p3 }
  0x2d   :  { %v63_v25 = vld [vmem:[#allocation5 + $0x98] sm:$0xff]  ;;  %v1360_v26 = vpack.c.bf16 %v58_v23, %v56_v22  ;;  %v60_v28 = vld [vmem:[#allocation5 + $0x80] sm:$0xff]  ;;  %v62_v29 = vld [vmem:[#allocation5 + $0x90] sm:$0xff]  ;;  %v1523_v22 = vmov 2475754826  }
  0x2e   :  { %v1362_v27 = vpack.c.bf16 %v63_v25, %v61_v24  ;;  %v65_v30 = vld [vmem:[#allocation5 + $0xa8] sm:$0xff]  ;;  %v67_v31 = vld [vmem:[#allocation5 + $0xb8] sm:$0xff]  ;;  %v1364_v32 = vpack.c.bf16 %v62_v29, %v60_v28  ;;  %v64_v34 = vld [vmem:[#allocation5 + $0xa0] sm:$0xff]  ;;  %v1524_v24 = vmov 2131351028   ;;  %p1495_p6 = pnand %p1494_p5, %p1488_p2 }
  0x2f   :  { %1353 = vmatpush1.bf16.msra.mxu0 %v1352_v14  ;;  %1387 = vmatpush1.bf16.msra.mxu1 %v1352_v14  ;;  %v1366_v33 = vpack.c.bf16 %v67_v31, %v65_v30  ;;  %v66_v35 = vld [vmem:[#allocation5 + $0xb0] sm:$0xff]  ;;  %v69_v36 = vld [vmem:[#allocation5 + $0xc8] sm:$0xff]  ;;  %v71_v37 = vld [vmem:[#allocation5 + $0xd8] sm:$0xff]  ;;  %v1526_v28 = vmov 920167782  }
  0x30   :  { %1355 = vmatprep.subr.bf16.mxu0 %v1354_v15  ;;  %1380 = vmatprep.subr.bf16.mxu1 %v1354_v15  ;;  %v1368_v38 = vpack.c.bf16 %v66_v35, %v64_v34  ;;  %v1370_v39 = vpack.c.bf16 %v71_v37, %v69_v36  ;;  %v68_v40 = vld [vmem:[#allocation5 + $0xc0] sm:$0xff]  ;;  %v70_v41 = vld [vmem:[#allocation5 + $0xd0] sm:$0xff]  ;;  %v73_v42 = vld [vmem:[#allocation5 + $0xe8] sm:$0xff]  ;;  %v1527_v35 = vmov 1326507024  }
  0x31   :  { %v75_v43 = vld [vmem:[#allocation5 + $0xf8] sm:$0xff]  ;;  %v1372_v44 = vpack.c.bf16 %v70_v41, %v68_v40  ;;  %v72_v46 = vld [vmem:[#allocation5 + $0xe0] sm:$0xff]  ;;  %v74_v47 = vld [vmem:[#allocation5 + $0xf0] sm:$0xff] }
  0x32   :  { %v1374_v45 = vpack.c.bf16 %v75_v43, %v73_v42  ;;  %v1376_v48 = vpack.c.bf16 %v74_v47, %v72_v46  ;;  %v40_v49 = vld [vmem:[#allocation2] sm:$0xff]  ;;  %v41_v50 = vld [vmem:[#allocation2 + $0x8] sm:$0xff] }
  0x33   :  { %1357 = vmatpush1.bf16.msra.mxu0 %v1356_v20  ;;  %1388 = vmatpush1.bf16.msra.mxu1 %v1356_v20  ;;  %v42_v51 = vmul.f32 0.6666667, %v40_v49  ;;  %v43_v52 = vmul.f32 0.6666667, %v41_v50 }
  0x34   :  { %1359 = vmatprep.subr.bf16.mxu0 %v1358_v21  ;;  %1381 = vmatprep.subr.bf16.mxu1 %v1358_v21 }
  0x37   :  { %1361 = vmatpush1.bf16.msra.mxu0 %v1360_v26  ;;  %1389 = vmatpush1.bf16.msra.mxu1 %v1360_v26  ;;  %v1525_v26 = vmov 2102212464  }
  0x38   :  { %1363 = vmatprep.subr.bf16.mxu0 %v1362_v27  ;;  %1382 = vmatprep.subr.bf16.mxu1 %v1362_v27 }
  0x3b   :  { %1365 = vmatpush1.bf16.msra.mxu0 %v1364_v32  ;;  %1390 = vmatpush1.bf16.msra.mxu1 %v1364_v32 }
  0x3c   :  { %1367 = vmatprep.subr.bf16.mxu0 %v1366_v33  ;;  %1383 = vmatprep.subr.bf16.mxu1 %v1366_v33 }
  0x3f   :  { %1369 = vmatpush1.bf16.msra.mxu0 %v1368_v38  ;;  %1391 = vmatpush1.bf16.msra.mxu1 %v1368_v38 }
  0x40   :  { %1371 = vmatprep.subr.bf16.mxu0 %v1370_v39  ;;  %1384 = vmatprep.subr.bf16.mxu1 %v1370_v39 }
  0x43   :  { %1373 = vmatpush1.bf16.msra.mxu0 %v1372_v44  ;;  %1392 = vmatpush1.bf16.msra.mxu1 %v1372_v44 }
  0x44   :  { %1375 = vmatprep.subr.bf16.mxu0 %v1374_v45  ;;  %1385 = vmatprep.subr.bf16.mxu1 %v1374_v45 }
  0x47   :  { %1377 = vmatpush1.bf16.msra.mxu0 %v1376_v48  ;;  %1393 = vmatpush1.bf16.msra.mxu1 %v1376_v48 }
  0x4a   :  { %141 = vmatmul.mubr.f32.vlgmr.msra.gmra.mrb[0].mxu0 %v42_v51  ;;  %147 = vmatmul.mubr.f32.vlgmr.msra.gmra.mrb[0].mxu1 %v43_v52 }
 0x11d   :  { %v1571_v53 = vpop.f32.mrb[0].mxu0  ;;  %v1573_v54 = vpop.f32.mrb[0].mxu1 }
 0x11e   :  { %v153_v55 = vand.u32 2147483647, %v1571_v53  ;;  %v156_v56 = vand.u32 2139095040, %v1571_v53  ;;  %v1577_v57 = vpop.f32.mrb[1].mxu0  ;;  %v1579_v58 = vpop.f32.mrb[1].mxu1  ;;  %v362_v60 = vand.u32 2139095040, %v1573_v54 }
 0x11f   :  { %v359_v59 = vand.u32 2147483647, %v1573_v54  ;;  %v259_v1 = vand.u32 2139095040, %v1577_v57 }
 0x120   :  { %v157_v61 = vshrl.u32 %v156_v56, 23  ;;  %v160_v62 = vand.u32 8388607, %v153_v55  ;;  %v363_v63 = vshrl.u32 %v362_v60, 23 }
 0x121   :  { %v366_v0 = vand.u32 8388607, %v359_v59  ;;  %v260_v4 = vshrl.u32 %v259_v1, 23 }
 0x122   :  { %v1314_v2 = vadd.s32 4294967169, %v157_v61  ;;  %v1322_v3 = vadd.s32 4294967169, %v363_v63  ;;  %v161_v6 = vor.u32 8388608, %v160_v62 }
 0x123   :  { %v367_v7 = vor.u32 8388608, %v366_v0  ;;  %v1318_v9 = vadd.s32 4294967169, %v260_v4 }
 0x124   :  { %v163_v5 = vadd.s32 1, %v1314_v2  ;;  %v369_v8 = vadd.s32 1, %v1322_v3  ;;  %v1588_v14 = vshll.u32 %v161_v6, 8 }
 0x125   :  { %v1590_v15 = vshll.u32 %v367_v7, 8  ;;  %v1592_v16 = vadd.s32 1, %v1318_v9 }
 0x126   :  { %vm164_vm0 = vcmp.gt.s32.totalorder %v163_v5, 0  ;;  %vm370_vm1 = vcmp.gt.s32.totalorder %v369_v8, 0 }
 0x127   :  { %v165_v10 = vsel %vm164_vm0, %v163_v5, 0  ;;  %v371_v13 = vsel %vm370_vm1, %v369_v8, 0  ;;  %vm267_vm6 = vcmp.gt.s32.totalorder %v1592_v16, 0 }
 0x128   :  { %v166_v11 = vshrl.u32 %v165_v10, 5  ;;  %v167_v12 = vand.u32 31, %v165_v10  ;;  %v1595_v20 = vshrl.u32 %v371_v13, 5  ;;  %v373_v21 = vand.u32 31, %v371_v13 }
 0x12a   :  { %v168_v17 = vsub.s32 32, %v167_v12  ;;  %v170_v19 = vshll.u32 %v1522_v18, %v167_v12  ;;  %v173_v23 = vshll.u32 %v1523_v22, %v167_v12  ;;  %v176_v25 = vshll.u32 %v1524_v24, %v167_v12 }
 0x12b   :  { %v179_v27 = vshll.u32 %v1525_v26, %v167_v12  ;;  %v182_v29 = vshll.u32 %v1526_v28, %v167_v12  ;;  %vm185_vm2 = vcmp.lt.s32.totalorder %v166_v11, 1  ;;  %vm186_vm3 = vcmp.lt.s32.totalorder %v166_v11, 2 }
 0x12c   :  { %v171_v30 = vshrl.u32 %v1523_v22, %v168_v17  ;;  %v174_v31 = vshrl.u32 %v1524_v24, %v168_v17  ;;  %v177_v32 = vshrl.u32 %v1525_v26, %v168_v17  ;;  %v169_v33 = vshrl.u32 %v1522_v18, %v168_v17 }
 0x12d   :  { %v180_v34 = vshrl.u32 %v1526_v28, %v168_v17  ;;  %v183_v36 = vshrl.u32 %v1527_v35, %v168_v17  ;;  %v374_v40 = vsub.s32 32, %v373_v21  ;;  %vm187_vm4 = vcmp.lt.s32.totalorder %v166_v11, 3 }
 0x12e   :  { %v172_v37 = vor.u32 %v171_v30, %v170_v19  ;;  %v175_v38 = vor.u32 %v174_v31, %v173_v23  ;;  %v178_v39 = vor.u32 %v177_v32, %v176_v25  ;;  %vm188_vm5 = vcmp.lt.s32.totalorder %v166_v11, 4 }
 0x12f   :  { %v181_v41 = vor.u32 %v180_v34, %v179_v27  ;;  %v184_v42 = vor.u32 %v183_v36, %v182_v29  ;;  %v376_v50 = vshll.u32 %v1522_v18, %v373_v21  ;;  %v377_v56 = vshrl.u32 %v1523_v22, %v374_v40 }
 0x130   :  { %v189_v43 = vsel %vm185_vm2, %v169_v33, %v172_v37  ;;  %v190_v44 = vsel %vm188_vm5, %v178_v39, 2102212464  ;;  %v193_v45 = vsel %vm185_vm2, %v172_v37, %v175_v38  ;;  %v197_v46 = vsel %vm185_vm2, %v175_v38, %v178_v39 }
 0x131   :  { %v191_v47 = vsel %vm187_vm4, %v175_v38, %v190_v44  ;;  %v194_v48 = vsel %vm188_vm5, %v181_v41, 920167782  ;;  %v198_v49 = vsel %vm188_vm5, %v184_v42, 1326507024  ;;  %v379_v60 = vshll.u32 %v1523_v22, %v373_v21 }
 0x132   :  { %v195_v51 = vsel %vm187_vm4, %v178_v39, %v194_v48  ;;  %v199_v52 = vsel %vm187_vm4, %v181_v41, %v198_v49  ;;  %v192_v61 = vsel %vm186_vm3, %v189_v43, %v191_v47  ;;  %v380_v0 = vshrl.u32 %v1524_v24, %v374_v40 }
 0x133   :  { %v196_v62 = vsel %vm186_vm3, %v193_v45, %v195_v51  ;;  %v200_v63 = vsel %vm186_vm3, %v197_v46, %v199_v52  ;;  %v378_v5 = vor.u32 %v377_v56, %v376_v50  ;;  %v382_v7 = vshll.u32 %v1524_v24, %v373_v21 }
 0x134   :  { %v1619_v1 = vmul.u32.u64.low %v1588_v14, %v200_v63  ;;  %v1620_v2 = vmul.u32.u64.high %v1588_v14, %v200_v63, %v1619_v1  ;;  %v1623_v3 = vmul.u32.u64.low %v1588_v14, %v196_v62  ;;  %v1624_v4 = vmul.u32.u64.high %v1588_v14, %v196_v62, %v1623_v3 }
 0x135   :  { %v381_v6 = vor.u32 %v380_v0, %v379_v60  ;;  %v383_v8 = vshrl.u32 %v1525_v26, %v374_v40  ;;  %v375_v9 = vshrl.u32 %v1522_v18, %v374_v40  ;;  %v385_v10 = vshll.u32 %v1525_v26, %v373_v21 }
 0x136   :  { %v386_v11 = vshrl.u32 %v1526_v28, %v374_v40  ;;  %v389_v12 = vshrl.u32 %v1527_v35, %v374_v40  ;;  %v208_v13 = vmul.u32 %v1588_v14, %v192_v61  ;;  %v388_v19 = vshll.u32 %v1526_v28, %v373_v21 }
 0x137   :  { %v384_v17 = vor.u32 %v383_v8, %v382_v7  ;;  %vm391_vm7 = vcmp.lt.s32.totalorder %v1595_v20, 1  ;;  %vm210_vm8 = vc.u32 %v1620_v2, %v1623_v3  ;;  %v211_v23 = vadd.s32 1, %v1624_v4 }
 0x138   :  { %v387_v25 = vor.u32 %v386_v11, %v385_v10  ;;  %vm392_vm9 = vcmp.lt.s32.totalorder %v1595_v20, 2  ;;  %v390_v27 = vor.u32 %v389_v12, %v388_v19  ;;  %vm393_vm10 = vcmp.lt.s32.totalorder %v1595_v20, 3 }
 0x139   :  { %vm394_vm11 = vcmp.lt.s32.totalorder %v1595_v20, 4  ;;  %v399_v29 = vsel %vm391_vm7, %v378_v5, %v381_v6  ;;  %v212_v14 = vsel %vm210_vm8, %v211_v23, %v1624_v4  ;;  %v403_v31 = vsel %vm391_vm7, %v381_v6, %v384_v17 }
 0x13a   :  { %v396_v30 = vsel %vm394_vm11, %v384_v17, 2102212464  ;;  %v400_v21 = vsel %vm394_vm11, %v387_v25, 920167782  ;;  %v213_v32 = vadd.s32 %v212_v14, %v208_v13  ;;  %v395_v33 = vsel %vm391_vm7, %v375_v9, %v378_v5 }
 0x13b   :  { %v401_v34 = vsel %vm393_vm10, %v384_v17, %v400_v21  ;;  %v404_v36 = vsel %vm394_vm11, %v390_v27, 1326507024  ;;  %v397_v37 = vsel %vm393_vm10, %v381_v6, %v396_v30  ;;  %v268_v40 = vsel %vm267_vm6, %v1592_v16, 0 }
 0x13c   :  { %v402_v38 = vsel %vm392_vm9, %v399_v29, %v401_v34  ;;  %v405_v39 = vsel %vm393_vm10, %v387_v25, %v404_v36  ;;  %v214_v41 = vadd.s32 536870912, %v213_v32  ;;  %v398_v48 = vsel %vm392_vm9, %v395_v33, %v397_v37 }
 0x13d   :  { %v406_v42 = vsel %vm392_vm9, %v403_v31, %v405_v39  ;;  %v1651_v43 = vmul.u32.u64.low %v1590_v15, %v402_v38  ;;  %v1652_v44 = vmul.u32.u64.high %v1590_v15, %v402_v38, %v1651_v43  ;;  %v270_v49 = vand.u32 31, %v268_v40 }
 0x13e   :  { %v1656_v45 = vmul.u32.u64.low %v1590_v15, %v406_v42  ;;  %v1657_v46 = vmul.u32.u64.high %v1590_v15, %v406_v42, %v1656_v45  ;;  %v1659_v47 = vshrl.u32 %v214_v41, 30  ;;  %v414_v51 = vmul.u32 %v1590_v15, %v398_v48 }
 0x13f   :  { %v417_v50 = vadd.s32 1, %v1652_v44  ;;  %v271_v61 = vsub.s32 32, %v270_v49  ;;  %v256_v63 = vand.u32 2147483647, %v1577_v57  ;;  %v269_v1 = vshrl.u32 %v268_v40, 5 }
 0x140   :  { %v216_v16 = vshll.u32 %v1659_v47, 30  ;;  %vm416_vm12 = vc.u32 %v1657_v46, %v1651_v43  ;;  %v282_v8 = vshll.u32 %v1525_v26, %v270_v49  ;;  %v465_v10 = vand.u32 2139095040, %v1579_v58 }
 0x141   :  { %v418_v56 = vsel %vm416_vm12, %v417_v50, %v1652_v44  ;;  %v274_v15 = vshrl.u32 %v1523_v22, %v271_v61  ;;  %v277_v5 = vshrl.u32 %v1524_v24, %v271_v61  ;;  %v280_v6 = vshrl.u32 %v1525_v26, %v271_v61 }
 0x142   :  { %v1668_v52 = vsub.s32 %v213_v32, %v216_v16  ;;  %v419_v60 = vadd.s32 %v418_v56, %v414_v51  ;;  %v283_v9 = vshrl.u32 %v1526_v28, %v271_v61  ;;  %v263_v11 = vand.u32 8388607, %v256_v63 }
 0x143   :  { %v273_v12 = vshll.u32 %v1522_v18, %v270_v49  ;;  %v276_v13 = vshll.u32 %v1523_v22, %v270_v49  ;;  %v279_v17 = vshll.u32 %v1524_v24, %v270_v49  ;;  %v286_v25 = vshrl.u32 %v1527_v35, %v271_v61 }
 0x144   :  { %v219_v62 = vsub.s32 0, %v1668_v52  ;;  %v420_v20 = vadd.s32 536870912, %v419_v60  ;;  %v284_v23 = vor.u32 %v283_v9, %v282_v8  ;;  %vm291_vm13 = vcmp.lt.s32.totalorder %v269_v1, 4 }
 0x145   :  { %v275_v29 = vor.u32 %v274_v15, %v273_v12  ;;  %v278_v14 = vor.u32 %v277_v5, %v276_v13  ;;  %v281_v30 = vor.u32 %v280_v6, %v279_v17  ;;  %v285_v21 = vshll.u32 %v1526_v28, %v270_v49 }
 0x146   :  { %v1315_v0 = vmin.u32 %v219_v62, %v1668_v52  ;;  %v1674_v4 = vshrl.u32 %v420_v20, 30  ;;  %v297_v31 = vsel %vm291_vm13, %v284_v23, 920167782  ;;  %v466_v32 = vshrl.u32 %v465_v10, 23 }
 0x147   :  { %v287_v34 = vor.u32 %v286_v25, %v285_v21  ;;  %vm288_vm15 = vcmp.lt.s32.totalorder %v269_v1, 1  ;;  %vm290_vm0 = vcmp.lt.s32.totalorder %v269_v1, 3  ;;  %v264_v37 = vor.u32 8388608, %v263_v11 }
 0x148   :  { %v221_v7 = vclz %v1315_v0  ;;  %v422_v27 = vshll.u32 %v1674_v4, 30  ;;  %v296_v38 = vsel %vm288_vm15, %v275_v29, %v278_v14  ;;  %v298_v39 = vsel %vm290_vm0, %v281_v30, %v297_v31 }
 0x149   :  { %v1326_v40 = vadd.s32 4294967169, %v466_v32  ;;  %vm289_vm1 = vcmp.lt.s32.totalorder %v269_v1, 2  ;;  %v293_v42 = vsel %vm291_vm13, %v281_v30, 2102212464  ;;  %v272_v44 = vshrl.u32 %v1522_v18, %v271_v61 }
 0x14a   :  { %v1316_v19 = vadd.s32 4294967294, %v221_v7  ;;  %v1691_v36 = vsub.s32 %v419_v60, %v422_v27  ;;  %v299_v45 = vsel %vm289_vm1, %v296_v38, %v298_v39  ;;  %v300_v48 = vsel %vm288_vm15, %v278_v14, %v281_v30 }
 0x14b   :  { %v301_v49 = vsel %vm291_vm13, %v287_v34, 1326507024  ;;  %v304_v50 = vshll.u32 %v264_v37, 8  ;;  %v292_v51 = vsel %vm288_vm15, %v272_v44, %v275_v29  ;;  %v294_v56 = vsel %vm290_vm0, %v278_v14, %v293_v42 }
 0x14c   :  { %vm1317_vm14 = vcmp.lt.s32.totalorder %v1316_v19, 0  ;;  %v425_v16 = vsub.s32 0, %v1691_v36  ;;  %v302_v60 = vsel %vm290_vm0, %v284_v23, %v301_v49  ;;  %v472_v62 = vadd.s32 1, %v1326_v40 }
 0x14d   :  { %v224_v33 = vsel %vm1317_vm14, 0, %v1316_v19  ;;  %v303_v0 = vsel %vm289_vm1, %v300_v48, %v302_v60  ;;  %v1705_v61 = vmul.u32.u64.low %v304_v50, %v299_v45  ;;  %v1706_v15 = vmul.u32.u64.high %v304_v50, %v299_v45, %v1705_v61 }
 0x14e   :  { %v229_v41 = vsub.s32 4294967266, %v224_v33  ;;  %v225_v5 = vsub.s32 32, %v224_v33  ;;  %v1709_v6 = vmul.u32.u64.low %v304_v50, %v303_v0  ;;  %v1710_v7 = vmul.u32.u64.high %v304_v50, %v303_v0, %v1709_v6 }
 0x14f   :  { %v1323_v8 = vmin.u32 %v425_v16, %v1691_v36  ;;  %v295_v9 = vsel %vm289_vm1, %v292_v51, %v294_v56  ;;  %vm473_vm2 = vcmp.gt.s32.totalorder %v472_v62, 0  ;;  %v209_v10 = vadd.s32 %v1623_v3, %v1620_v2 }
 0x150   :  { %v230_v20 = vadd.s32 127, %v229_v41  ;;  %v474_v11 = vsel %vm473_vm2, %v472_v62, 0  ;;  %v314_v13 = vadd.s32 1, %v1706_v15  ;;  %v311_v19 = vmul.u32 %v304_v50, %v295_v9 }
 0x151   :  { %v227_v17 = vshrl.u32 %v209_v10, %v225_v5  ;;  %vm313_vm3 = vc.u32 %v1710_v7, %v1705_v61  ;;  %v476_v23 = vand.u32 31, %v474_v11  ;;  %v427_v25 = vclz %v1323_v8 }
 0x152   :  { %v231_v12 = vshll.u32 %v230_v20, 23  ;;  %v315_v27 = vsel %vm313_vm3, %v314_v13, %v1706_v15  ;;  %v226_v1 = vshll.u32 %v1668_v52, %v224_v33  ;;  %v462_v32 = vand.u32 2147483647, %v1579_v58 }
 0x153   :  { %v316_v29 = vadd.s32 %v315_v27, %v311_v19  ;;  %v477_v30 = vsub.s32 32, %v476_v23  ;;  %v1324_v3 = vadd.s32 4294967294, %v427_v25  ;;  %v488_v52 = vshll.u32 %v1525_v26, %v476_v23 }
 0x154   :  { %v232_v14 = vor.u32 4788187, %v231_v12  ;;  %v228_v21 = vor.u32 %v227_v17, %v226_v1  ;;  %v1728_v33 = vshrl.u32 %v474_v11, 5  ;;  %v469_v45 = vand.u32 8388607, %v462_v32 }
 0x155   :  { %v317_v2 = vadd.s32 536870912, %v316_v29  ;;  %v489_v37 = vshrl.u32 %v1526_v28, %v477_v30  ;;  %v480_v40 = vshrl.u32 %v1523_v22, %v477_v30  ;;  %vm1325_vm4 = vcmp.lt.s32.totalorder %v1324_v3, 0 }
 0x156   :  { %v233_v34 = vand.u32 2147483647, %v232_v14  ;;  %v235_v38 = vcvt.s32.f32 %v228_v21  ;;  %v483_v41 = vshrl.u32 %v1524_v24, %v477_v30  ;;  %v486_v42 = vshrl.u32 %v1525_v26, %v477_v30 }
 0x157   :  { %v1721_v31 = vshrl.u32 %v317_v2, 30  ;;  %v479_v48 = vshll.u32 %v1522_v18, %v476_v23  ;;  %v490_v49 = vor.u32 %v489_v37, %v488_v52  ;;  %v482_v50 = vshll.u32 %v1523_v22, %v476_v23 }
 0x158   :  { %v236_v16 = vmul.f32 %v235_v38, %v233_v34  ;;  %v485_v51 = vshll.u32 %v1524_v24, %v476_v23  ;;  %v492_v56 = vshrl.u32 %v1527_v35, %v477_v30  ;;  %v1738_v60 = vsel %vm1325_vm4, 0, %v1324_v3 }
 0x159   :  { %v319_v39 = vshll.u32 %v1721_v31, 30  ;;  %v481_v20 = vor.u32 %v480_v40, %v479_v48  ;;  %v484_v0 = vor.u32 %v483_v41, %v482_v50  ;;  %v491_v15 = vshll.u32 %v1526_v28, %v476_v23 }
 0x15a   :  { %v487_v26 = vor.u32 %v486_v42, %v485_v51  ;;  %vm497_vm5 = vcmp.lt.s32.totalorder %v1728_v33, 4  ;;  %v470_v6 = vor.u32 8388608, %v469_v45  ;;  %v237_v22 = vxor.u32 2147483648, %v236_v16 }
 0x15b   :  { %v320_v44 = vsub.s32 %v316_v29, %v319_v39  ;;  %v503_v8 = vsel %vm497_vm5, %v490_v49, 920167782  ;;  %v435_v24 = vsub.s32 4294967266, %v1738_v60  ;;  %v493_v9 = vor.u32 %v492_v56, %v491_v15 }
 0x15c   :  { %vm494_vm6 = vcmp.lt.s32.totalorder %v1728_v33, 1  ;;  %vm496_vm7 = vcmp.lt.s32.totalorder %v1728_v33, 3  ;;  %vm1749_vm8 = vcmp.le.f32.partialorder %v153_v55, 0.7853982  ;;  %vm155_vm9 = vcmp.lt.s32.totalorder %v1571_v53, 0 }
 0x15d   :  { %v322_v62 = vsub.s32 0, %v320_v44  ;;  %v502_v10 = vsel %vm494_vm6, %v481_v20, %v484_v0  ;;  %v504_v11 = vsel %vm496_vm7, %v487_v26, %v503_v8  ;;  %v239_v12 = vsub.s32 4, %v1659_v47 }
 0x15e   :  { %v506_v17 = vsel %vm494_vm6, %v484_v0, %v487_v26  ;;  %v510_v19 = vshll.u32 %v470_v6, 8  ;;  %v238_v55 = vsel %vm155_vm9, %v237_v22, %v236_v16  ;;  %v436_v23 = vadd.s32 127, %v435_v24 }
 0x15f   :  { %v1319_v5 = vmin.u32 %v322_v62, %v320_v44  ;;  %vm495_vm10 = vcmp.lt.s32.totalorder %v1728_v33, 2  ;;  %v507_v25 = vsel %vm497_vm5, %v493_v9, 1326507024  ;;  %v478_v27 = vshrl.u32 %v1522_v18, %v477_v30 }
 0x160   :  { %v505_v1 = vsel %vm495_vm10, %v502_v10, %v504_v11  ;;  %v508_v29 = vsel %vm496_vm7, %v490_v49, %v507_v25  ;;  %v312_v14 = vadd.s32 %v1705_v61, %v1710_v7  ;;  %v499_v2 = vsel %vm497_vm5, %v487_v26, 2102212464 }
 0x161   :  { %v324_v35 = vclz %v1319_v5  ;;  %v509_v3 = vsel %vm495_vm10, %v506_v17, %v508_v29  ;;  %v241_v18 = vsel %vm1749_vm8, %v1571_v53, %v238_v55  ;;  %v498_v37 = vsel %vm494_vm6, %v478_v27, %v481_v20 }
 0x162   :  { %v1782_v38 = vmul.u32.u64.low %v510_v19, %v509_v3  ;;  %v1783_v39 = vmul.u32.u64.high %v510_v19, %v509_v3, %v1782_v38  ;;  %v1785_v61 = vmul.u32.u64.low %v510_v19, %v505_v1  ;;  %v1786_v7 = vmul.u32.u64.high %v510_v19, %v505_v1, %v1785_v61 }
 0x163   :  { %v1320_v13 = vadd.s32 4294967294, %v324_v35  ;;  %v500_v42 = vsel %vm496_vm7, %v484_v0, %v499_v2  ;;  %1427 = vcosq.f32 %v241_v18  ;;  %v431_v45 = vsub.s32 32, %v1738_v60 }
 0x164   :  { %1429 = vsinq.f32 %v241_v18  ;;  %v240_v16 = vsel %vm155_vm9, %v239_v12, %v1659_v47  ;;  %v415_v50 = vadd.s32 %v1651_v43, %v1657_v46  ;;  %v437_v51 = vshll.u32 %v436_v23, 23 }
 0x165   :  { %vm1321_vm11 = vcmp.lt.s32.totalorder %v1320_v13, 0  ;;  %vm519_vm12 = vc.u32 %v1783_v39, %v1785_v61  ;;  %v520_v20 = vadd.s32 1, %v1786_v7  ;;  %v242_v0 = vsel %vm1749_vm8, 0, %v240_v16 }
 0x166   :  { %v327_v21 = vsel %vm1321_vm11, 0, %v1320_v13  ;;  %v433_v62 = vshrl.u32 %v415_v50, %v431_v45  ;;  %v432_v43 = vshll.u32 %v1691_v36, %v1738_v60  ;;  %v438_v46 = vor.u32 4788187, %v437_v51 }
 0x167   :  { %v328_v30 = vsub.s32 32, %v327_v21  ;;  %v332_v34 = vsub.s32 4294967266, %v327_v21  ;;  %v329_v40 = vshll.u32 %v320_v44, %v327_v21  ;;  %v501_v44 = vsel %vm495_vm10, %v498_v37, %v500_v42 }
 0x168   :  { %v517_v47 = vmul.u32 %v510_v19, %v501_v44  ;;  %v342_v33 = vsub.s32 4, %v1721_v31  ;;  %v521_v5 = vsel %vm519_vm12, %v520_v20, %v1786_v7  ;;  %v434_v22 = vor.u32 %v433_v62, %v432_v43 }
 0x169   :  { %v330_v52 = vshrl.u32 %v312_v14, %v328_v30  ;;  %v333_v41 = vadd.s32 127, %v332_v34  ;;  %v817_v24 = vadd.s32 3, %v242_v0  ;;  %vm258_vm13 = vcmp.lt.s32.totalorder %v1577_v57, 0 }
 0x16a   :  { %v522_v8 = vadd.s32 %v521_v5, %v517_v47  ;;  %v439_v10 = vand.u32 2147483647, %v438_v46  ;;  %v343_v11 = vsel %vm258_vm13, %v342_v33, %v1721_v31  ;;  %vm257_vm14 = vcmp.le.f32.partialorder %v256_v63, 0.7853982 }
 0x16b   :  { %v331_v48 = vor.u32 %v330_v52, %v329_v40  ;;  %v334_v49 = vshll.u32 %v333_v41, 23  ;;  %v1528_v60 = vmov 1966171168   ;;  %v246_v19 = vand.u32 3, %v242_v0 }
 0x16c   :  { %v523_v35 = vadd.s32 536870912, %v522_v8  ;;  %v576_v13 = vunpack.c.l.s4 %v1528_v60  ;;  %v441_v55 = vcvt.s32.f32 %v434_v22  ;;  %v578_v25 = vlaneseq }
 0x16d   :  { %v335_v56 = vor.u32 4788187, %v334_v49  ;;  %v338_v15 = vcvt.s32.f32 %v331_v48  ;;  %v1428_v28 = vpop.eup %1427  ;;  %v818_v27 = vand.u32 3, %v817_v24  ;;  %v345_v1 = vsel %vm257_vm14, 0, %v343_v11 }
 0x16e   :  { %v1430_v12 = vpop.eup %1429  ;;  %v1812_v17 = vshrl.u32 %v523_v35, 30  ;;  %v252_v14 = vxor.u32 2147483648, %v1428_v28  ;;  %v442_v21 = vmul.f32 %v441_v55, %v439_v10  ;;  %v577_v2 = vunpack.c.0.s8 %v576_v13 }
 0x16f   :  { %v336_v26 = vand.u32 2147483647, %v335_v56  ;;  %v249_v31 = vxor.u32 2147483648, %v1430_v12  ;;  %v579_v3 = vshrl.u32 %v578_v25, 7  ;;  %v921_v18 = vadd.s32 3, %v345_v1 }
 0x170   :  { %v525_v29 = vshll.u32 %v1812_v17, 30  ;;  %vm248_vm15 = vcmp.eq.s32.totalorder %v246_v19, 0  ;;  %vm251_vm0 = vcmp.eq.s32.totalorder %v246_v19, 2  ;;  %vm820_vm1 = vcmp.eq.s32.totalorder %v818_v27, 0 }
 0x171   :  { %v339_v6 = vmul.f32 %v338_v15, %v336_v26  ;;  %v250_v34 = vsel %vm248_vm15, %v1428_v28, %v249_v31  ;;  %v253_v37 = vsel %vm251_vm0, %v252_v14, %v1430_v12  ;;  %vm823_vm2 = vcmp.eq.s32.totalorder %v818_v27, 2 }
 0x172   :  { %v1816_v63 = vsub.s32 %v522_v8, %v525_v29  ;;  %v443_v38 = vxor.u32 2147483648, %v442_v21  ;;  %v822_v7 = vsel %vm820_vm1, %v1428_v28, %v249_v31  ;;  %v825_v40 = vsel %vm823_vm2, %v252_v14, %v1430_v12 }
 0x173   :  { %v340_v9 = vxor.u32 2147483648, %v339_v6  ;;  %v349_v52 = vand.u32 3, %v345_v1  ;;  %vm247_vm3 = vcmp.lt.s32.totalorder %v246_v19, 2  ;;  %v922_v42 = vand.u32 3, %v921_v18 }
 0x174   :  { %v528_v30 = vsub.s32 0, %v1816_v63  ;;  %v254_v45 = vsel %vm247_vm3, %v250_v34, %v253_v37  ;;  %vm819_vm4 = vcmp.lt.s32.totalorder %v818_v27, 2  ;;  %v1821_v48 = vsub.s32 %v577_v2, %v579_v3 }
 0x175   :  { %v341_v36 = vsel %vm258_vm13, %v340_v9, %v339_v6  ;;  %vm245_vm5 = vweird.f32 %v1571_v53  ;;  %v826_v16 = vsel %vm819_vm4, %v822_v7, %v825_v40  ;;  %vm361_vm6 = vcmp.lt.s32.totalorder %v1573_v54, 0 }
 0x176   :  { %v344_v23 = vsel %vm257_vm14, %v1577_v57, %v341_v36  ;;  %v1327_v41 = vmin.u32 %v528_v30, %v1816_v63  ;;  %vm348_vm7 = vweird.f32 %v1577_v57  ;;  %v444_v51 = vsel %vm361_vm6, %v443_v38, %v442_v21 }
 0x177   :  { %1431 = vcosq.f32 %v344_v23  ;;  %vm350_vm8 = vcmp.lt.s32.totalorder %v349_v52, 2  ;;  %vm351_vm9 = vcmp.eq.s32.totalorder %v349_v52, 0  ;;  %v255_v62 = vsel %vm245_vm5, nan, %v254_v45 }
 0x178   :  { %1433 = vsinq.f32 %v344_v23  ;;  %v530_v49 = vclz %v1327_v41  ;;  %vm354_vm10 = vcmp.eq.s32.totalorder %v349_v52, 2  ;;  %vm923_vm11 = vcmp.lt.s32.totalorder %v922_v42, 2 }
 0x179   :  { %v827_v0 = vsel %vm245_vm5, nan, %v826_v16  ;;  %vm927_vm12 = vcmp.eq.s32.totalorder %v922_v42, 2  ;;  %vm924_vm14 = vcmp.eq.s32.totalorder %v922_v42, 0  ;;  %v565_v43 = vmul.f32 0.088388346, %v255_v62 }
 0x17a   :  { %v1328_v44 = vadd.s32 4294967294, %v530_v49  ;;  %v1140_v6 = vmul.f32 0.088388346, %v827_v0  ;;  %vm1832_vm15 = vcmp.le.f32.partialorder %v359_v59, 0.7853982  ;;  %v518_v10 = vadd.s32 %v1785_v61, %v1783_v39 }
 0x17b   :  { %v447_v11 = vsel %vm1832_vm15, %v1573_v54, %v444_v51  ;;  %v445_v59 = vsub.s32 4, %v1674_v4  ;;  %vm1847_vm0 = vcmp.lt.s32.totalorder %v578_v25, 256  ;;  %vm464_vm1 = vcmp.lt.s32.totalorder %v1579_v58, 0 }
 0x17c   :  { %vm1329_vm13 = vcmp.lt.s32.totalorder %v1328_v44, 0  ;;  %1435 = vcosq.f32 %v447_v11  ;;  %vm463_vm2 = vcmp.le.f32.partialorder %v462_v32, 0.7853982 }
 0x17d   :  { %v533_v47 = vsel %vm1329_vm13, 0, %v1328_v44  ;;  %v446_v21 = vsel %vm361_vm6, %v445_v59, %v1674_v4  ;;  %1437 = vsinq.f32 %v447_v11 }
 0x17e   :  { %v534_v5 = vsub.s32 32, %v533_v47  ;;  %v538_v24 = vsub.s32 4294967266, %v533_v47  ;;  %v535_v39 = vshll.u32 %v1816_v63, %v533_v47  ;;  %v448_v62 = vsel %vm1832_vm15, 0, %v446_v21 }
 0x17f   :  { %v1025_v47 = vadd.s32 3, %v448_v62 }
 0x180   :  { %v539_v60 = vadd.s32 127, %v538_v24  ;;  %v536_v13 = vshrl.u32 %v518_v10, %v534_v5 }
 0x181   :  { %v1432_v50 = vpop.eup %1431 }
 0x182   :  { %v1434_v56 = vpop.eup %1433  ;;  %v355_v20 = vxor.u32 2147483648, %v1432_v50  ;;  %v540_v61 = vshll.u32 %v539_v60, 23  ;;  %v537_v25 = vor.u32 %v536_v13, %v535_v39 }
 0x183   :  { %v352_v26 = vxor.u32 2147483648, %v1434_v56 }
 0x184   :  { %v356_v53 = vsel %vm354_vm10, %v355_v20, %v1434_v56  ;;  %v929_v15 = vsel %vm927_vm12, %v355_v20, %v1434_v56  ;;  %v541_v2 = vor.u32 4788187, %v540_v61  ;;  %v544_v56 = vcvt.s32.f32 %v537_v25 }
 0x185   :  { %v353_v46 = vsel %vm351_vm9, %v1432_v50, %v352_v26  ;;  %v926_v33 = vsel %vm924_vm14, %v1432_v50, %v352_v26  ;;  %vm451_vm9 = vweird.f32 %v1573_v54  ;;  %vm554_vm10 = vweird.f32 %v1579_v58 }
 0x186   :  { %v357_v8 = vsel %vm350_vm8, %v353_v46, %v356_v53  ;;  %v930_v22 = vsel %vm923_vm11, %v926_v33, %v929_v15  ;;  %v542_v44 = vand.u32 2147483647, %v541_v2  ;;  %v548_v53 = vsub.s32 4, %v1812_v17  ;;  %v1436_v15 = vpop.eup %1435 }
 0x187   :  { %v358_v35 = vsel %vm348_vm7, nan, %v357_v8  ;;  %v931_v28 = vsel %vm348_vm7, nan, %v930_v22  ;;  %v1438_v46 = vpop.eup %1437  ;;  %v452_v8 = vand.u32 3, %v448_v62  ;;  %v1026_v22 = vand.u32 3, %v1025_v47 }
 0x188   :  { %v566_v12 = vmul.f32 0.088388346, %v358_v35  ;;  %v1141_v36 = vmul.f32 0.088388346, %v931_v28  ;;  %v545_v26 = vmul.f32 %v544_v56, %v542_v44  ;;  %v549_v5 = vsel %vm464_vm1, %v548_v53, %v1812_v17 }
 0x189   :  { %v455_v24 = vxor.u32 2147483648, %v1438_v46  ;;  %v458_v9 = vxor.u32 2147483648, %v1436_v15  ;;  %v551_v35 = vsel %vm463_vm2, 0, %v549_v5  ;;  %vm454_vm3 = vcmp.eq.s32.totalorder %v452_v8, 0 }
 0x18a   :  { %v573_v19 = vcombine.low %v565_v43, %v566_v12  ;;  %v574_v55 = vcombine.high %v565_v43, %v566_v12  ;;  %v1148_v23 = vcombine.low %v1140_v6, %v1141_v36  ;;  %v1149_v27 = vcombine.high %v1140_v6, %v1141_v36 }
 0x18b   :  { %v546_v43 = vxor.u32 2147483648, %v545_v26  ;;  %vm457_vm4 = vcmp.eq.s32.totalorder %v452_v8, 2  ;;  %v1129_v28 = vadd.s32 3, %v551_v35  ;;  %v456_v10 = vsel %vm454_vm3, %v1436_v15, %v455_v24 }
 0x18c   :  { %v581_v1 = vrot.slane %v573_v19, %v1821_v48  ;;  %v588_v29 = vrot.slane %v574_v55, %v1821_v48  ;;  %v1156_v31 = vrot.slane %v1148_v23, %v1821_v48  ;;  %v1163_v14 = vrot.slane %v1149_v27, %v1821_v48 }
 0x18d   :  { %v547_v33 = vsel %vm464_vm1, %v546_v43, %v545_v26  ;;  %v459_v11 = vsel %vm457_vm4, %v458_v9, %v1438_v46  ;;  %vm1028_vm5 = vcmp.eq.s32.totalorder %v1026_v22, 0  ;;  %vm1031_vm6 = vcmp.eq.s32.totalorder %v1026_v22, 2 }
 0x18e   :  { %v589_v3 = vcombine.high %v581_v1, %v581_v1  ;;  %v590_v18 = vcombine.high %v588_v29, %v588_v29  ;;  %v597_v63 = vrot.slane %v581_v1, %v1821_v48  ;;  %v604_v30 = vrot.slane %v588_v29, %v1821_v48 }
 0x18f   :  { %v1164_v34 = vcombine.high %v1156_v31, %v1156_v31  ;;  %v1165_v37 = vcombine.high %v1163_v14, %v1163_v14  ;;  %v1172_v38 = vrot.slane %v1156_v31, %v1821_v48  ;;  %v1179_v7 = vrot.slane %v1163_v14, %v1821_v48 }
 0x190   :  { %v611_v40 = vrot.slane %v589_v3, %v1821_v48  ;;  %v618_v52 = vrot.slane %v590_v18, %v1821_v48  ;;  %v619_v4 = vcombine.high %v597_v63, %v597_v63  ;;  %v620_v41 = vcombine.high %v604_v30, %v604_v30  ;;  %693 = vst.msk [vmem:[#allocation7] ss:$2 sm:$0x3] %vm1847_vm0, %v597_v63 }
 0x191   :  { %701 = vst.msk [vmem:[#allocation7 + $0x10] ss:$2 sm:$0x3] %vm1847_vm0, %v604_v30  ;;  %v1186_v42 = vrot.slane %v1164_v34, %v1821_v48  ;;  %v1193_v45 = vrot.slane %v1165_v37, %v1821_v48  ;;  %v1194_v49 = vcombine.high %v1172_v38, %v1172_v38  ;;  %v1195_v16 = vcombine.high %v1179_v7, %v1179_v7 }
 0x192   :  { %1265 = vst.msk [vmem:[#allocation7 + $0x1] ss:$2 sm:$0x3] %vm1847_vm0, %v1172_v38  ;;  %1273 = vst.msk [vmem:[#allocation7 + $0x11] ss:$2 sm:$0x3] %vm1847_vm0, %v1179_v7  ;;  %v621_v50 = vcombine.high %v611_v40, %v611_v40  ;;  %v622_v51 = vcombine.high %v618_v52, %v618_v52  ;;  %v550_v6 = vsel %vm463_vm2, %v1579_v58, %v547_v33 }
 0x193   :  { %695 = vst.msk [vmem:[#allocation7 + $0x4] ss:$2 sm:$0x3] %vm1847_vm0, %v611_v40  ;;  %697 = vst.msk [vmem:[#allocation7 + $0x8] ss:$2 sm:$0x3] %vm1847_vm0, %v619_v4  ;;  %v1196_v20 = vcombine.high %v1186_v42, %v1186_v42  ;;  %v1197_v0 = vcombine.high %v1193_v45, %v1193_v45  ;;  %1439 = vcosq.f32 %v550_v6  ;;  %v1030_v32 = vsel %vm1028_vm5, %v1436_v15, %v455_v24 }
 0x194   :  { %703 = vst.msk [vmem:[#allocation7 + $0x14] ss:$2 sm:$0x3] %vm1847_vm0, %v618_v52  ;;  %705 = vst.msk [vmem:[#allocation7 + $0x18] ss:$2 sm:$0x3] %vm1847_vm0, %v620_v41  ;;  %1441 = vsinq.f32 %v550_v6  ;;  %v1033_v12 = vsel %vm1031_vm6, %v458_v9, %v1438_v46 }
 0x195   :  { %1267 = vst.msk [vmem:[#allocation7 + $0x5] ss:$2 sm:$0x3] %vm1847_vm0, %v1186_v42  ;;  %1269 = vst.msk [vmem:[#allocation7 + $0x9] ss:$2 sm:$0x3] %vm1847_vm0, %v1194_v49 }
 0x196   :  { %1275 = vst.msk [vmem:[#allocation7 + $0x15] ss:$2 sm:$0x3] %vm1847_vm0, %v1193_v45  ;;  %1277 = vst.msk [vmem:[#allocation7 + $0x19] ss:$2 sm:$0x3] %vm1847_vm0, %v1195_v16 }
 0x197   :  { %699 = vst.msk [vmem:[#allocation7 + $0xc] ss:$2 sm:$0x3] %vm1847_vm0, %v621_v50  ;;  %707 = vst.msk [vmem:[#allocation7 + $0x1c] ss:$2 sm:$0x3] %vm1847_vm0, %v622_v51 }
 0x198   :  { %1271 = vst.msk [vmem:[#allocation7 + $0xd] ss:$2 sm:$0x3] %vm1847_vm0, %v1196_v20  ;;  %1279 = vst.msk [vmem:[#allocation7 + $0x1d] ss:$2 sm:$0x3] %vm1847_vm0, %v1197_v0 }
 0x199   :  { %vm453_vm7 = vcmp.lt.s32.totalorder %v452_v8, 2  ;;  %vm1027_vm8 = vcmp.lt.s32.totalorder %v1026_v22, 2  ;;  %v555_v36 = vand.u32 3, %v551_v35  ;;  %v1130_v60 = vand.u32 3, %v1129_v28 }
 0x19a   :  { %v460_v17 = vsel %vm453_vm7, %v456_v10, %v459_v11  ;;  %v1034_v59 = vsel %vm1027_vm8, %v1030_v32, %v1033_v12 }
 0x19b   :  { %v461_v55 = vsel %vm451_vm9, nan, %v460_v17  ;;  %v1035_v27 = vsel %vm451_vm9, nan, %v1034_v59  ;;  %vm560_vm11 = vcmp.eq.s32.totalorder %v555_v36, 2  ;;  %vm1135_vm12 = vcmp.eq.s32.totalorder %v1130_v60, 2 }
 0x19c   :  { %vm557_vm13 = vcmp.eq.s32.totalorder %v555_v36, 0  ;;  %vm1132_vm14 = vcmp.eq.s32.totalorder %v1130_v60, 0  ;;  %vm556_vm15 = vcmp.lt.s32.totalorder %v555_v36, 2  ;;  %vm1131_vm1 = vcmp.lt.s32.totalorder %v1130_v60, 2 }
 0x19d   :  { %v1440_v13 = vpop.eup %1439  ;;  %v567_v14 = vmul.f32 0.088388346, %v461_v55  ;;  %v1142_v21 = vmul.f32 0.088388346, %v1035_v27 }
 0x19e   :  { %v1442_v19 = vpop.eup %1441  ;;  %v561_v23 = vxor.u32 2147483648, %v1440_v13 }
 0x19f   :  { %v558_v39 = vxor.u32 2147483648, %v1442_v19 }
 0x1a0   :  { %v562_v61 = vsel %vm560_vm11, %v561_v23, %v1442_v19  ;;  %v1137_v1 = vsel %vm1135_vm12, %v561_v23, %v1442_v19 }
 0x1a1   :  { %v559_v29 = vsel %vm557_vm13, %v1440_v13, %v558_v39  ;;  %v1134_v31 = vsel %vm1132_vm14, %v1440_v13, %v558_v39 }
 0x1a2   :  { %v563_v54 = vsel %vm556_vm15, %v559_v29, %v562_v61  ;;  %v1138_v25 = vsel %vm1131_vm1, %v1134_v31, %v1137_v1 }
 0x1a3   :  { %v564_v2 = vsel %vm554_vm10, nan, %v563_v54  ;;  %v1139_v3 = vsel %vm554_vm10, nan, %v1138_v25 }
 0x1a4   :  { %v568_v18 = vmul.f32 0.088388346, %v564_v2  ;;  %v1143_v63 = vmul.f32 0.088388346, %v1139_v3 }
 0x1a6   :  { %v623_v30 = vcombine.low %v567_v14, %v568_v18  ;;  %v624_v34 = vcombine.high %v567_v14, %v568_v18  ;;  %v1198_v37 = vcombine.low %v1142_v21, %v1143_v63  ;;  %v1199_v38 = vcombine.high %v1142_v21, %v1143_v63 }
 0x1a8   :  { %v631_v7 = vrot.slane %v623_v30, %v1821_v48  ;;  %v638_v40 = vrot.slane %v624_v34, %v1821_v48  ;;  %v1206_v52 = vrot.slane %v1198_v37, %v1821_v48  ;;  %v1213_v4 = vrot.slane %v1199_v38, %v1821_v48 }
 0x1aa   :  { %v639_v41 = vcombine.high %v631_v7, %v631_v7  ;;  %v640_v42 = vcombine.high %v638_v40, %v638_v40  ;;  %v647_v45 = vrot.slane %v631_v7, %v1821_v48  ;;  %v654_v58 = vrot.slane %v638_v40, %v1821_v48 }
 0x1ab   :  { %v1214_v49 = vcombine.high %v1206_v52, %v1206_v52  ;;  %v1215_v16 = vcombine.high %v1213_v4, %v1213_v4  ;;  %v1222_v50 = vrot.slane %v1206_v52, %v1821_v48  ;;  %v1229_v51 = vrot.slane %v1213_v4, %v1821_v48 }
 0x1ac   :  { %v661_v44 = vrot.slane %v639_v41, %v1821_v48  ;;  %v668_v56 = vrot.slane %v640_v42, %v1821_v48  ;;  %v669_v62 = vcombine.high %v647_v45, %v647_v45  ;;  %v670_v20 = vcombine.high %v654_v58, %v654_v58  ;;  %709 = vst.msk [vmem:[#allocation7 + $0x20] ss:$2 sm:$0x3] %vm1847_vm0, %v647_v45 }
 0x1ad   :  { %717 = vst.msk [vmem:[#allocation7 + $0x30] ss:$2 sm:$0x3] %vm1847_vm0, %v654_v58  ;;  %v1236_v0 = vrot.slane %v1214_v49, %v1821_v48  ;;  %v1243_v26 = vrot.slane %v1215_v16, %v1821_v48  ;;  %v1244_v53 = vcombine.high %v1222_v50, %v1222_v50  ;;  %v1245_v15 = vcombine.high %v1229_v51, %v1229_v51 }
 0x1ae   :  { %1281 = vst.msk [vmem:[#allocation7 + $0x21] ss:$2 sm:$0x3] %vm1847_vm0, %v1222_v50  ;;  %1289 = vst.msk [vmem:[#allocation7 + $0x31] ss:$2 sm:$0x3] %vm1847_vm0, %v1229_v51  ;;  %v671_v47 = vcombine.high %v661_v44, %v661_v44  ;;  %v672_v43 = vcombine.high %v668_v56, %v668_v56 }
 0x1af   :  { %711 = vst.msk [vmem:[#allocation7 + $0x24] ss:$2 sm:$0x3] %vm1847_vm0, %v661_v44  ;;  %713 = vst.msk [vmem:[#allocation7 + $0x28] ss:$2 sm:$0x3] %vm1847_vm0, %v669_v62  ;;  %v1246_v48 = vcombine.high %v1236_v0, %v1236_v0  ;;  %v1247_v46 = vcombine.high %v1243_v26, %v1243_v26 }
 0x1b0   :  { %719 = vst.msk [vmem:[#allocation7 + $0x34] ss:$2 sm:$0x3] %vm1847_vm0, %v668_v56  ;;  %721 = vst.msk [vmem:[#allocation7 + $0x38] ss:$2 sm:$0x3] %vm1847_vm0, %v670_v20 }
 0x1b1   :  { %1283 = vst.msk [vmem:[#allocation7 + $0x25] ss:$2 sm:$0x3] %vm1847_vm0, %v1236_v0  ;;  %1285 = vst.msk [vmem:[#allocation7 + $0x29] ss:$2 sm:$0x3] %vm1847_vm0, %v1244_v53 }
 0x1b2   :  { %1291 = vst.msk [vmem:[#allocation7 + $0x35] ss:$2 sm:$0x3] %vm1847_vm0, %v1243_v26  ;;  %1293 = vst.msk [vmem:[#allocation7 + $0x39] ss:$2 sm:$0x3] %vm1847_vm0, %v1245_v15 }
 0x1b3   :  { %715 = vst.msk [vmem:[#allocation7 + $0x2c] ss:$2 sm:$0x3] %vm1847_vm0, %v671_v47  ;;  %723 = vst.msk [vmem:[#allocation7 + $0x3c] ss:$2 sm:$0x3] %vm1847_vm0, %v672_v43 }
 0x1b4   :  { %1287 = vst.msk [vmem:[#allocation7 + $0x2d] ss:$2 sm:$0x3] %vm1847_vm0, %v1246_v48  ;;  %1295 = vst.msk [vmem:[#allocation7 + $0x3d] ss:$2 sm:$0x3] %vm1847_vm0, %v1247_v46 }
 0x1b5   :  { %1498 = shalt.err (!%p1495_p6)
}
 0x1b6   :  { %s1499_s12 = scalar_lea.hbm %s1971_s2, 1024 }
 0x1b7   :  { %p1500_p7 = scmp.ne.s32.totalorder %s1971_s2, %s1499_s12  ;;  %p1503_p8 = scmp.lt.u32.totalorder %s1499_s12, %s1971_s2 }
 0x1b9   :  { %p1505_p9 = pnand %p1503_p8, %p1500_p7 }
 0x1bb   :  { %1508 = shalt.err (!%p1505_p9)
}
 0x1bc   :  { %s1530_s17 = smov 64   ;;  %s1531_s18 = smov 4  }
 0x1bd   :  { %1307 = dma.vmem_to_hbm [thread:$0]  %s1302_s8, 1024, %s1971_s2, [#allocation4], %s1530_s17, %s1530_s17, %s1531_s18  }
 0x1be   :  { %1513 = dma.done.wait [#allocation4], 1024  }
 0x1bf   :  { %1514 = vsyncadd [#allocation4], 4294966272 }
 0x1c0   :  { %1311 = vsyncpa [#allocation3], 1 }
 0x1c1   :  { %1312 = vsyncpa [#allocation6], 1 }
 0x1c2   :  { %1313 = vsyncpa [#allocation4], 1 }

</bundles_post_ra>
